<compile_context>
chip_gen: v5e
topology: v5e:2x2
jax: 0.10.0
libtpu: 0.0.40
codegen_flags: <defaults>
</compile_context>

<pallas_src>
import jax
import jax.numpy as jnp
from jax import lax
from jax.experimental import pallas as pl
from jax.experimental.pallas import tpu as pltpu


def _round_up(x, m):
    return ((x + m - 1) // m) * m


# --------------------------------------------------------------------------- #
# Kernels
# --------------------------------------------------------------------------- #
def _linear_tiled_kernel(x_ref, wt_ref, b_ref, o_ref, acc_ref):
    """One (i, j, k) grid step: acc (+)= x_tile @ wt_tile; bias folded into k==0.

    NOTE: correctness relies on K being the innermost grid axis and marked
    "arbitrary" -- the single VMEM accumulator is carried across the K loop.
    Do not reorder the grid or mark axis 2 "parallel".
    """
    k = pl.program_id(2)

    @pl.when(k == 0)
    def _init():
        # Initialize the accumulator with the broadcast f32 bias; removes the
        # extra (tm, tn) add + bias read from the writeback (finalize) step.
        acc_ref[...] = jnp.broadcast_to(b_ref[...], acc_ref.shape)

    # x_tile: (tm, tk) @ wt_tile: (tk, tn) -> straight MXU matmul; the weight
    # was pre-transposed once at init, so no per-step tile transpose.
    acc_ref[...] += jnp.dot(x_ref[...], wt_ref[...],
                            preferred_element_type=jnp.float32)

    @pl.when(k == pl.num_programs(2) - 1)
    def _finalize():
        o_ref[...] = acc_ref[...].astype(o_ref.dtype)


def _linear_small_kernel(x_ref, wt_ref, b_ref, o_ref):
    """Single-shot kernel for small problems: all operands resident in VMEM."""
    acc = jnp.dot(x_ref[...], wt_ref[...], preferred_element_type=jnp.float32)
    o_ref[...] = (acc + b_ref[...]).astype(o_ref.dtype)


# --------------------------------------------------------------------------- #
# Module wrapper (parameters prepared once, like nn.Linear init)
# --------------------------------------------------------------------------- #
class PallasLinear:
    """Pallas-TPU equivalent of `nn.Linear(input_dim, output_dim, bias=...)`.

    weight is accepted in PyTorch layout (D_out, D_in). All per-parameter work
    (transpose to (D_in, D_out), optional dtype cast, padding to tile
    multiples) happens ONCE in __init__, so the per-call path never re-pads or
    re-transposes the (memory-bound) weight stream.
    """

    # Problems whose whole working set is below this many elements skip the
    # 3-D grid entirely (grid/pipeline fixed cost ~0.35us/step would dominate).
    _SMALL_ELEMS = 256 * 1024

    def __init__(self, weight, bias=None, *, compute_dtype=None,
                 tm=256, tn=512, tk=1024):
        weight = jnp.asarray(weight)
        d_out, d_in = weight.shape
        self.d_in, self.d_out = d_in, d_out

        if compute_dtype is None:
            # Pass bf16 weights on v6e/v7x for full MXU rate; f32 kept as-is.
            compute_dtype = weight.dtype
        self.compute_dtype = jnp.dtype(compute_dtype)

        # Tile sizes: multiples of 256 feed the v6e/v7x 2x256^2 MXU (and are
        # valid 128-multiples for v5e); clamp to the 128-rounded problem size.
        self.tn = min(tn, _round_up(d_out, 128))
        self.tk = min(tk, _round_up(d_in, 128))
        self.tm_max = tm

        self.n_pad = _round_up(d_out, self.tn)
        self.k_pad = _round_up(d_in, self.tk)

        # --- one-time weight prep: transpose -> cast -> pad -------------------
        wt = weight.T.astype(self.compute_dtype)                 # (D_in, D_out)
        self.wt = wt                                             # small path
        if (self.k_pad, self.n_pad) != (d_in, d_out):
            self.wt_padded = jnp.pad(
                wt, ((0, self.k_pad - d_in), (0, self.n_pad - d_out)))
        else:
            self.wt_padded = wt

        # Bias stays in f32 (added onto the f32 accumulator; never downcast).
        if bias is None:
            b = jnp.zeros((d_out,), jnp.float32)
        else:
            b = jnp.asarray(bias, jnp.float32)
        self.b = b.reshape(1, d_out)
        self.b_padded = jnp.pad(self.b, ((0, 0), (0, self.n_pad - d_out)))

    # ------------------------------------------------------------------ call
    def __call__(self, x):
        x = jnp.asarray(x)
        assert x.ndim == 2 and x.shape[1] == self.d_in, "bad input shape"
        B = x.shape[0]
        footprint = B * self.d_in + self.d_in * self.d_out + B * self.d_out
        if footprint <= self._SMALL_ELEMS:
            return self._forward_small(x)
        return self._forward_tiled(x)

    # ------------------------------------------------------ small fast path
    def _forward_small(self, x):
        out_dtype = x.dtype
        B = x.shape[0]
        xc = x.astype(self.compute_dtype)
        return pl.pallas_call(
            _linear_small_kernel,
            out_shape=jax.ShapeDtypeStruct((B, self.d_out), out_dtype),
            in_specs=[pl.BlockSpec(memory_space=pltpu.MemorySpace.VMEM)] * 3,
            out_specs=pl.BlockSpec(memory_space=pltpu.MemorySpace.VMEM),
        )(xc, self.wt, self.b)

    # ----------------------------------------------------------- tiled path
    def _forward_tiled(self, x):
        out_dtype = x.dtype
        B = x.shape[0]
        xc = x.astype(self.compute_dtype)

        tn, tk = self.tn, self.tk
        n_pad, k_pad = self.n_pad, self.k_pad
        tm = min(self.tm_max, _round_up(B, 8))
        m_pad = _round_up(B, tm)

        # v7x megacore: with a single M block, expose >=2 N blocks so both
        # TensorCores get work ("parallel" axes need >=2 blocks to pay off).
        if m_pad // tm == 1 and n_pad // tn == 1 and tn >= 256 and tn % 256 == 0:
            tn = tn // 2  # still divides n_pad and stays a 128-multiple

        # Only x may need per-call padding (weight/bias were padded at init).
        if (m_pad, k_pad) != (B, self.d_in):
            xc = jnp.pad(xc, ((0, m_pad - B), (0, k_pad - self.d_in)))

        grid = (m_pad // tm, n_pad // tn, k_pad // tk)

        in_bytes = jnp.dtype(self.compute_dtype).itemsize
        out_bytes = jnp.dtype(out_dtype).itemsize
        cost = pl.CostEstimate(
            flops=2 * m_pad * k_pad * n_pad,
            transcendentals=0,
            bytes_accessed=(grid[1] * m_pad * k_pad * in_bytes      # x re-read / N block
                            + grid[0] * k_pad * n_pad * in_bytes    # W re-read / M block
                            + m_pad * n_pad * out_bytes             # output
                            + n_pad * 4),                           # bias
        )

        # Double-buffered working set; keep the limit well under v7x's 64 MiB.
        ws = (2 * tm * tk * in_bytes + 2 * tk * tn * in_bytes
              + 2 * tm * tn * out_bytes + tm * tn * 4 + 2 * tn * 4)
        vmem_limit = int(min(60 * 2 ** 20, max(32 * 2 ** 20, 2 * ws)))

        out_p = pl.pallas_call(
            _linear_tiled_kernel,
            out_shape=jax.ShapeDtypeStruct((m_pad, n_pad), out_dtype),
            grid_spec=pltpu.PrefetchScalarGridSpec(
                num_scalar_prefetch=0,
                grid=grid,
                in_specs=[
                    pl.BlockSpec((tm, tk), lambda i, j, k: (i, k)),  # x tile
                    pl.BlockSpec((tk, tn), lambda i, j, k: (k, j)),  # W^T tile
                    pl.BlockSpec((1, tn), lambda i, j, k: (0, j)),   # f32 bias tile
                ],
                out_specs=pl.BlockSpec((tm, tn), lambda i, j, k: (i, j)),
                scratch_shapes=[pltpu.VMEM((tm, tn), jnp.float32)],
            ),
            compiler_params=pltpu.CompilerParams(
                # K (axis 2) is the reduction axis: innermost + "arbitrary";
                # M/N are independent -> "parallel" (megacore sharding).
                dimension_semantics=("parallel", "parallel", "arbitrary"),
                vmem_limit_bytes=vmem_limit,
            ),
            cost_estimate=cost,
        )(xc, self.wt_padded, self.b_padded)

        if (m_pad, n_pad) == (B, self.d_out):
            return out_p
        return out_p[:B, :self.d_out]


# --------------------------------------------------------------------------- #
# Demo / correctness check
# --------------------------------------------------------------------------- #
if __name__ == "__main__":
    key = jax.random.PRNGKey(0)

    # --- Case 1: small shapes from the module (batch=8, in=32, out=16) -------
    B, D_in, D_out = 8, 32, 16
    k1, k2, k3, key = jax.random.split(key, 4)
    bound = 1.0 / (D_in ** 0.5)
    weight = jax.random.uniform(k2, (D_out, D_in), jnp.float32, -bound, bound)
    bias = jax.random.uniform(k3, (D_out,), jnp.float32, -bound, bound)
    x = jax.random.normal(k1, (B, D_in), jnp.float32)

    layer = PallasLinear(weight, bias)
    out = jax.block_until_ready(layer(x))
    ref = x @ weight.T + bias
    assert out.shape == (B, D_out)
    assert jnp.allclose(out, ref, atol=1e-5, rtol=1e-5), "small-path mismatch"

    # --- Case 2: moderate shapes to exercise the tiled (M, N, K) grid path ---
    B2, D_in2, D_out2 = 512, 1024, 768
    k1, k2, k3, key = jax.random.split(key, 4)
    bound2 = 1.0 / (D_in2 ** 0.5)
    weight2 = jax.random.uniform(k2, (D_out2, D_in2), jnp.float32, -bound2, bound2)
    bias2 = jax.random.uniform(k3, (D_out2,), jnp.float32, -bound2, bound2)
    x2 = jax.random.normal(k1, (B2, D_in2), jnp.float32)

    layer2 = PallasLinear(weight2, bias2)
    out2 = jax.block_until_ready(layer2(x2))
    ref2 = jnp.dot(x2, weight2.T, precision=lax.Precision.HIGHEST) + bias2
    assert out2.shape == (B2, D_out2)
    assert jnp.allclose(out2, ref2, atol=2e-3, rtol=2e-3), "tiled-path mismatch"

    print("KERNEL_OK")
</pallas_src>

<mosaic_0001>
module attributes {stable_mosaic.version = 11 : i64} {
  func.func @_linear_small_kernel(%arg0: memref<8x32xf32, #tpu.memory_space<vmem>>, %arg1: memref<32x16xf32, #tpu.memory_space<vmem>>, %arg2: memref<1x16xf32, #tpu.memory_space<vmem>>, %arg3: memref<8x16xf32, #tpu.memory_space<vmem>>) attributes {dimension_semantics = [], scalar_prefetch = 0 : i64, scratch_operands = 0 : i64, tpu.core_type = #tpu.core_type<tc>} {
    %c0 = arith.constant 0 : index
    %c0_0 = arith.constant 0 : index
    %0 = vector.load %arg0[%c0, %c0_0] : memref<8x32xf32, #tpu.memory_space<vmem>>, vector<8x32xf32>
    %c0_1 = arith.constant 0 : index
    %c0_2 = arith.constant 0 : index
    %1 = vector.load %arg1[%c0_1, %c0_2] : memref<32x16xf32, #tpu.memory_space<vmem>>, vector<32x16xf32>
    %cst = arith.constant dense<0.000000e+00> : vector<8x16xf32>
    %2 = tpu.matmul %0, %1, %cst {dimension_numbers = #tpu.dot_dimension_numbers<[1], [0], [0], [1], [0, 0, 1, 1], [], []>} : vector<8x32xf32>, vector<32x16xf32>, vector<8x16xf32> -> vector<8x16xf32>
    %c0_3 = arith.constant 0 : index
    %c0_4 = arith.constant 0 : index
    %3 = vector.load %arg2[%c0_3, %c0_4] : memref<1x16xf32, #tpu.memory_space<vmem>>, vector<1x16xf32>
    %4 = vector.broadcast %3 : vector<1x16xf32> to vector<8x16xf32>
    %5 = arith.addf %2, %4 : vector<8x16xf32>
    %c0_5 = arith.constant 0 : index
    %c0_6 = arith.constant 0 : index
    %6 = vector.load %arg3[%c0_5, %c0_6] : memref<8x16xf32, #tpu.memory_space<vmem>>, vector<8x16xf32>
    tpu.vector_store %arg3[%c0_5, %c0_6], %5 {strides = array<i32>} : memref<8x16xf32, #tpu.memory_space<vmem>>, vector<8x16xf32>,
    return
  }
}

</mosaic_0001>

<bundles_post_ra>
// kernel: tpu_custom_call.1
= control target key start
LH: loop header
LB: loop body
LE: loop exit
PB: predicated region body
PF: predicated region fallthrough
CT: control target
= control target key end

     0   :  { %s137_s0 = inlined_call_operand.vmem [shape: f32[8,32], index: 0, kind: input, shape index: {}]   ;;  %s138_s1 = inlined_call_operand.vmem [shape: f32[32,16], index: 1, kind: input, shape index: {}]   ;;  %s139_s2 = inlined_call_operand.vmem [shape: f32[1,16], index: 2, kind: input, shape index: {}]   ;;  %s140_s3 = inlined_call_operand.hbm [shape: f32[8,16], index: 3, kind: output, shape index: {}]  }
   0x1   :  { %v19_v0 = vld [vmem:[%s138_s1 + $0x18] sm:$0xff]  ;;  %v18_v1 = vld [vmem:[%s138_s1 + $0x10] sm:$0xff]  ;;  %v17_v2 = vld [vmem:[%s138_s1 + $0x8] sm:$0xff] }
   0x2   :  { %40 = vmatpush.msra.mxu0 %v19_v0 }
   0x3   :  { %8 = vsyncpa [#allocation3], 0  ;;  %v16_v3 = vld [vmem:[%s138_s1] sm:$0xff]  ;;  %vm24_vm0 = vcmask 261120   ;;  %s95_s24 = smov [#allocation2]   ;;  %s57_s28 = sshll.u32 %s140_s3, 4  ;;  %s58_s28 = int_to_ptr.hbm [resolvable:$true] %s57_s28 }
   0x4   :  { %41 = vmatpush.msra.mxu0 %v18_v1  ;;  %v15_v4 = vld [vmem:[%s137_s0] sm:$0xff]  ;;  %s55_s25 = sshll.u32 %s95_s24, 4  ;;  %vm48_vm1 = vcmask 130048   ;;  %s56_s25 = int_to_ptr.vmem [resolvable:$true] %s55_s25 }
   0x5   :  { %v68_v5 = vld [vmem:[%s139_s2] ss:$0 sm:$0xff] }
   0x6   :  { %42 = vmatpush.msra.mxu0 %v17_v2 }
   0x8   :  { %43 = vmatpush.msra.mxu0 %v16_v3 }
   0x9   :  { %66 = vmatmul.msk.f32.vlgmr.msra.gmra.mxu0 %vm24_vm0, %v15_v4 }
  0x86   :  { %v45_v6 = vpop.f32.mrf.mxu0 }
  0x87   :  { %v46_v7 = vadd.f32 %v68_v5, %v45_v6 }
  0x89   :  { %49 = vst.msk [vmem:[#allocation2] sm:$0xff] %vm48_vm1, %v46_v7 }
  0x8a   :  { %60 = dma.vmem_to_hbm [thread:$0]  %s56_s25, 128, %s58_s28, [#allocation3]  }
  0x8b   :  { %93 = dma.done.wait [#allocation3], 128  }
  0x8c   :  { %94 = vsyncadd [#allocation3], 4294967168 }
  0x8d   :  { %65 = vsyncpa [#allocation3], 1 }

</bundles_post_ra>
